<compile_context>
chip_gen: v7x
topology: tpu7x:2x2x1
jax: 0.10.0
libtpu: 0.0.40
codegen_flags: <defaults>
</compile_context>

<pallas_src>
import functools

import numpy as np
import jax
import jax.numpy as jnp
from jax.experimental import pallas as pl
from jax.experimental.pallas import tpu as pltpu


def _sp_reduce_kernel(x_ref, out_ref, pad_ref, *, window, tlength, rank):
    """Fused spike/dip weighting.

    x_ref   : (T, R)          fp32 VMEM — temporal factor
    out_ref : (T, R)          fp32 VMEM — (1 - change)^5 * factor
    pad_ref : (T + window, R) fp32 VMEM — zero-padded staging scratch
    """
    x = x_ref[...]                              # (T, R) fp32

    pad_top = (window - 1) // 2                 # identical for even/odd window
    inv_w = 1.0 / float(window)                 # trace-time constant

    # ---- moving average along time ('same' output via zero padding) -------
    pad_ref[...] = jnp.zeros_like(pad_ref)
    pad_ref[pad_top:pad_top + tlength, :] = x

    acc = jnp.zeros((tlength, rank), jnp.float32)
    for j in range(window):                     # static, fully unrolled (VPU adds)
        acc = acc + pad_ref[j:j + tlength, :]
    ma = acc * inv_w

    # ---- squared rate of change: (ma[t] - ma[t+1])^2, ma[T] := 0 -----------
    pad_ref[0:tlength, :] = ma
    pad_ref[tlength:tlength + 1, :] = jnp.zeros((1, rank), jnp.float32)
    change = pad_ref[0:tlength, :] - pad_ref[1:tlength + 1, :]
    change = change * change

    # ---- global normalization + spike/dip-reducing weight ------------------
    inv_total = 1.0 / jnp.sum(change)           # scalar reciprocal, hoisted
    change = change * inv_total
    p = 1.0 - change                            # (1 - change)^5 via 3 muls
    p2 = p * p
    out_ref[...] = (p2 * p2 * p) * x


class SpReduce:
    """JAX/Pallas port of the PyTorch `sp_reduce` module (forward pass)."""

    def __init__(self, window, rank, tlength):
        self.window = int(window)
        self.rank = int(rank)
        self.tlength = int(tlength)

    def __call__(self, factor):
        factor = jnp.asarray(factor, jnp.float32).reshape(
            self.tlength, self.rank)

        kernel = functools.partial(
            _sp_reduce_kernel,
            window=self.window, tlength=self.tlength, rank=self.rank)

        out = pl.pallas_call(
            kernel,
            out_shape=jax.ShapeDtypeStruct(
                (self.tlength, self.rank), jnp.float32),
            in_specs=[pl.BlockSpec(memory_space=pltpu.MemorySpace.VMEM)],
            out_specs=pl.BlockSpec(memory_space=pltpu.MemorySpace.VMEM),
            scratch_shapes=[
                pltpu.VMEM((self.tlength + self.window, self.rank),
                           jnp.float32)],
        )(factor)

        # torch returns (1, 1, K, R) via broadcasting; keep that shape.
        return out.reshape(1, 1, self.tlength, self.rank)


def _reference(factor, window, tlength, rank):
    """Pure-numpy mirror of the PyTorch sp_reduce forward."""
    x = np.asarray(factor, np.float32).reshape(tlength, rank)
    pad_top = (window - 1) // 2
    padded = np.zeros((tlength + window - 1, rank), np.float32)
    padded[pad_top:pad_top + tlength] = x
    ma = np.stack([padded[t:t + window].sum(axis=0)
                   for t in range(tlength)]).astype(np.float32) / window
    ma_pad = np.concatenate([ma, np.zeros((1, rank), np.float32)], axis=0)
    change = (ma_pad[:tlength] - ma_pad[1:]) ** 2
    change = change / change.sum()
    return (1.0 - change) ** 5 * x


if __name__ == "__main__":
    # Small deterministic setup consistent with the module:
    # temporal factor K x R with K = tlength.
    window, rank, tlength = 5, 8, 64

    key = jax.random.PRNGKey(0)
    factor = jax.random.normal(key, (tlength, rank), dtype=jnp.float32)

    model = SpReduce(window, rank, tlength)
    out = jax.block_until_ready(model(factor))

    ref = _reference(np.asarray(jax.device_get(factor)), window, tlength, rank)
    got = np.asarray(jax.device_get(out)).reshape(tlength, rank)

    rel_err = np.max(np.abs(got - ref)) / (np.max(np.abs(ref)) + 1e-6)
    assert rel_err <= 1e-4, rel_err
    print("KERNEL_OK")
</pallas_src>

<mosaic_0001>
module attributes {stable_mosaic.version = 11 : i64} {
  func.func @_sp_reduce_kernel(%arg0: memref<64x8xf32, #tpu.memory_space<vmem>>, %arg1: memref<64x8xf32, #tpu.memory_space<vmem>>, %arg2: memref<69x8xf32, #tpu.memory_space<vmem>>) attributes {dimension_semantics = [], scalar_prefetch = 0 : i64, scratch_operands = 1 : i64, tpu.core_type = #tpu.core_type<tc>} {
    %c0 = arith.constant 0 : index
    %c0_0 = arith.constant 0 : index
    %0 = vector.load %arg0[%c0, %c0_0] : memref<64x8xf32, #tpu.memory_space<vmem>>, vector<64x8xf32>
    %cst = arith.constant 0.000000e+00 : f32
    %1 = vector.broadcast %cst : f32 to vector<69x8xf32>
    %c0_1 = arith.constant 0 : index
    %c0_2 = arith.constant 0 : index
    %2 = vector.load %arg2[%c0_1, %c0_2] : memref<69x8xf32, #tpu.memory_space<vmem>>, vector<69x8xf32>
    tpu.vector_store %arg2[%c0_1, %c0_2], %1 {strides = array<i32>} : memref<69x8xf32, #tpu.memory_space<vmem>>, vector<69x8xf32>,
    %c2 = arith.constant 2 : index
    %c0_3 = arith.constant 0 : index
    %3 = vector.load %arg2[%c2, %c0_3] : memref<69x8xf32, #tpu.memory_space<vmem>>, vector<64x8xf32>
    tpu.vector_store %arg2[%c2, %c0_3], %0 {strides = array<i32>} : memref<69x8xf32, #tpu.memory_space<vmem>>, vector<64x8xf32>,
    %cst_4 = arith.constant 0.000000e+00 : f32
    %4 = vector.broadcast %cst_4 : f32 to vector<64x8xf32>
    %c0_5 = arith.constant 0 : index
    %c0_6 = arith.constant 0 : index
    %5 = vector.load %arg2[%c0_5, %c0_6] : memref<69x8xf32, #tpu.memory_space<vmem>>, vector<64x8xf32>
    %6 = arith.addf %4, %5 : vector<64x8xf32>
    %c1 = arith.constant 1 : index
    %c0_7 = arith.constant 0 : index
    %7 = vector.load %arg2[%c1, %c0_7] : memref<69x8xf32, #tpu.memory_space<vmem>>, vector<64x8xf32>
    %8 = arith.addf %6, %7 : vector<64x8xf32>
    %c2_8 = arith.constant 2 : index
    %c0_9 = arith.constant 0 : index
    %9 = vector.load %arg2[%c2_8, %c0_9] : memref<69x8xf32, #tpu.memory_space<vmem>>, vector<64x8xf32>
    %10 = arith.addf %8, %9 : vector<64x8xf32>
    %c3 = arith.constant 3 : index
    %c0_10 = arith.constant 0 : index
    %11 = vector.load %arg2[%c3, %c0_10] : memref<69x8xf32, #tpu.memory_space<vmem>>, vector<64x8xf32>
    %12 = arith.addf %10, %11 : vector<64x8xf32>
    %c4 = arith.constant 4 : index
    %c0_11 = arith.constant 0 : index
    %13 = vector.load %arg2[%c4, %c0_11] : memref<69x8xf32, #tpu.memory_space<vmem>>, vector<64x8xf32>
    %14 = arith.addf %12, %13 : vector<64x8xf32>
    %cst_12 = arith.constant 2.000000e-01 : f32
    %15 = vector.broadcast %cst_12 : f32 to vector<64x8xf32>
    %16 = arith.mulf %14, %15 : vector<64x8xf32>
    %c0_13 = arith.constant 0 : index
    %c0_14 = arith.constant 0 : index
    %17 = vector.load %arg2[%c0_13, %c0_14] : memref<69x8xf32, #tpu.memory_space<vmem>>, vector<64x8xf32>
    tpu.vector_store %arg2[%c0_13, %c0_14], %16 {strides = array<i32>} : memref<69x8xf32, #tpu.memory_space<vmem>>, vector<64x8xf32>,
    %cst_15 = arith.constant 0.000000e+00 : f32
    %18 = vector.broadcast %cst_15 : f32 to vector<1x8xf32>
    %c64 = arith.constant 64 : index
    %c0_16 = arith.constant 0 : index
    %19 = vector.load %arg2[%c64, %c0_16] : memref<69x8xf32, #tpu.memory_space<vmem>>, vector<1x8xf32>
    tpu.vector_store %arg2[%c64, %c0_16], %18 {strides = array<i32>} : memref<69x8xf32, #tpu.memory_space<vmem>>, vector<1x8xf32>,
    %c0_17 = arith.constant 0 : index
    %c0_18 = arith.constant 0 : index
    %20 = vector.load %arg2[%c0_17, %c0_18] : memref<69x8xf32, #tpu.memory_space<vmem>>, vector<64x8xf32>
    %c1_19 = arith.constant 1 : index
    %c0_20 = arith.constant 0 : index
    %21 = vector.load %arg2[%c1_19, %c0_20] : memref<69x8xf32, #tpu.memory_space<vmem>>, vector<64x8xf32>
    %22 = arith.subf %20, %21 : vector<64x8xf32>
    %23 = arith.mulf %22, %22 : vector<64x8xf32>
    %24 = vector.shape_cast %23 : vector<64x8xf32> to vector<1x64x8xf32>
    %cst_21 = arith.constant dense<0.000000e+00> : vector<1xf32>
    %25 = vector.multi_reduction <add>, %24, %cst_21 [1, 2] : vector<1x64x8xf32> to vector<1xf32>
    %26 = vector.shape_cast %25 : vector<1xf32> to vector<1x1x1xf32>
    %27 = vector.extract %26[0, 0, 0] : f32 from vector<1x1x1xf32>
    %cst_22 = arith.constant 1.000000e+00 : f32
    %28 = arith.divf %cst_22, %27 : f32
    %29 = vector.broadcast %28 : f32 to vector<64x8xf32>
    %30 = arith.mulf %23, %29 : vector<64x8xf32>
    %cst_23 = arith.constant 1.000000e+00 : f32
    %31 = vector.broadcast %cst_23 : f32 to vector<64x8xf32>
    %32 = arith.subf %31, %30 : vector<64x8xf32>
    %33 = arith.mulf %32, %32 : vector<64x8xf32>
    %34 = arith.mulf %33, %33 : vector<64x8xf32>
    %35 = arith.mulf %34, %32 : vector<64x8xf32>
    %36 = arith.mulf %35, %0 : vector<64x8xf32>
    %c0_24 = arith.constant 0 : index
    %c0_25 = arith.constant 0 : index
    %37 = vector.load %arg1[%c0_24, %c0_25] : memref<64x8xf32, #tpu.memory_space<vmem>>, vector<64x8xf32>
    tpu.vector_store %arg1[%c0_24, %c0_25], %36 {strides = array<i32>} : memref<64x8xf32, #tpu.memory_space<vmem>>, vector<64x8xf32>,
    return
  }
}

</mosaic_0001>

<bundles_post_ra>
// kernel: tpu_custom_call.1
= control target key start
LH: loop header
LB: loop body
LE: loop exit
PB: predicated region body
PF: predicated region fallthrough
CT: control target
= control target key end

     0   :  { %vm16_vm0 = vcmask 64512   ;;  %vm25_vm1 = vcmask 61440   ;;  %v260_v3 = vmov 0.0   ;;  %vm131_vm2 = vcmask 57344   ;;  %s402_s0 = inlined_call_operand.vmem [shape: f32[64,8], index: 0, kind: input, shape index: {}]   ;;  %s403_s1 = inlined_call_operand.vmem [shape: f32[64,8], index: 1, kind: output, shape index: {}]  }
   0x1   :  { %v274_v0 = vld [vmem:[%s402_s0] sm:$0xff]  ;;  %v279_v1 = vld [vmem:[%s402_s0 + $0x8] sm:$0xff]  ;;  %v284_v2 = vld [vmem:[%s402_s0 + $0x10] sm:$0xff]  ;;  %17 = vst.msk [vmem:[#allocation2] sm:$0xff] %vm16_vm0, %v260_v3 }
   0x2   :  { %18 = vst.msk [vmem:[#allocation2 + $0x8] sm:$0xff] %vm16_vm0, %v260_v3  ;;  %19 = vst.msk [vmem:[#allocation2 + $0x10] sm:$0xff] %vm16_vm0, %v260_v3  ;;  %v306_v4 = vld [vmem:[%s402_s0 + $0x18] sm:$0xff]  ;;  %v311_v5 = vld [vmem:[%s402_s0 + $0x20] sm:$0xff] }
   0x3   :  { %20 = vst.msk [vmem:[#allocation2 + $0x18] sm:$0xff] %vm16_vm0, %v260_v3  ;;  %21 = vst.msk [vmem:[#allocation2 + $0x20] sm:$0xff] %vm16_vm0, %v260_v3  ;;  %v316_v6 = vld [vmem:[%s402_s0 + $0x28] sm:$0xff]  ;;  %v327_v7 = vld [vmem:[%s402_s0 + $0x30] sm:$0xff] }
   0x4   :  { %22 = vst.msk [vmem:[#allocation2 + $0x28] sm:$0xff] %vm16_vm0, %v260_v3  ;;  %23 = vst.msk [vmem:[#allocation2 + $0x30] sm:$0xff] %vm16_vm0, %v260_v3  ;;  %v332_v8 = vld [vmem:[%s402_s0 + $0x38] sm:$0xff] }
   0x5   :  { %24 = vst.msk [vmem:[#allocation2 + $0x38] sm:$0xff] %vm16_vm0, %v260_v3  ;;  %27 = vst.msk [vmem:[#allocation2 + $0x2] sm:$0xff] %vm16_vm0, %v274_v0 }
   0x6   :  { %26 = vst.msk [vmem:[#allocation2 + $0x40] sm:$0x1f] %vm25_vm1, %v260_v3 }
   0x7   :  { %28 = vst.msk [vmem:[#allocation2 + $0xa] sm:$0xff] %vm16_vm0, %v279_v1  ;;  %29 = vst.msk [vmem:[#allocation2 + $0x12] sm:$0xff] %vm16_vm0, %v284_v2 }
   0x8   :  { %30 = vst.msk [vmem:[#allocation2 + $0x1a] sm:$0xff] %vm16_vm0, %v306_v4  ;;  %31 = vst.msk [vmem:[#allocation2 + $0x22] sm:$0xff] %vm16_vm0, %v311_v5 }
   0x9   :  { %32 = vst.msk [vmem:[#allocation2 + $0x2a] sm:$0xff] %vm16_vm0, %v316_v6  ;;  %33 = vst.msk [vmem:[#allocation2 + $0x32] sm:$0xff] %vm16_vm0, %v327_v7 }
   0xa   :  { %34 = vst.msk [vmem:[#allocation2 + $0x3a] sm:$0xff] %vm16_vm0, %v332_v8 }
   0xc   :  { %v35_v9 = vld [vmem:[#allocation2] sm:$0xff] }
   0xd   :  { %v51_v17 = vld [vmem:[#allocation2 + $0x1] sm:$0xff] }
   0xe   :  { %v36_v10 = vld [vmem:[#allocation2 + $0x8] sm:$0xff]  ;;  %v37_v11 = vld [vmem:[#allocation2 + $0x10] sm:$0xff]  ;;  %v59_v21 = vadd.f32 %v51_v17, %v35_v9 }
   0xf   :  { %v38_v12 = vld [vmem:[#allocation2 + $0x18] sm:$0xff]  ;;  %v39_v13 = vld [vmem:[#allocation2 + $0x20] sm:$0xff]  ;;  %v52_v18 = vld [vmem:[#allocation2 + $0x9] sm:$0xff] }
  0x10   :  { %v40_v14 = vld [vmem:[#allocation2 + $0x28] sm:$0xff]  ;;  %v41_v15 = vld [vmem:[#allocation2 + $0x30] sm:$0xff]  ;;  %v54_v20 = vld [vmem:[#allocation2 + $0x19] sm:$0xff]  ;;  %v60_v25 = vadd.f32 %v52_v18, %v36_v10 }
  0x11   :  { %v42_v16 = vld [vmem:[#allocation2 + $0x38] sm:$0xff]  ;;  %v55_v22 = vld [vmem:[#allocation2 + $0x21] sm:$0xff]  ;;  %v56_v23 = vld [vmem:[#allocation2 + $0x29] sm:$0xff]  ;;  %v62_v27 = vadd.f32 %v54_v20, %v38_v12 }
  0x12   :  { %v53_v19 = vld [vmem:[#allocation2 + $0x11] sm:$0xff]  ;;  %v58_v28 = vld [vmem:[#allocation2 + $0x39] sm:$0xff]  ;;  %v63_v29 = vadd.f32 %v55_v22, %v39_v13  ;;  %v64_v30 = vadd.f32 %v56_v23, %v40_v14  ;;  %v67_v32 = vld [vmem:[#allocation2 + $0x2] sm:$0xff] }
  0x13   :  { %v57_v24 = vld [vmem:[#allocation2 + $0x31] sm:$0xff]  ;;  %v61_v26 = vadd.f32 %v53_v19, %v37_v11  ;;  %v66_v34 = vadd.f32 %v58_v28, %v42_v16  ;;  %v70_v36 = vld [vmem:[#allocation2 + $0x1a] sm:$0xff]  ;;  %v71_v37 = vld [vmem:[#allocation2 + $0x22] sm:$0xff]  ;;  %v75_v38 = vadd.f32 %v67_v32, %v59_v21 }
  0x14   :  { %v65_v31 = vadd.f32 %v57_v24, %v41_v15  ;;  %v68_v33 = vld [vmem:[#allocation2 + $0xa] sm:$0xff]  ;;  %v69_v35 = vld [vmem:[#allocation2 + $0x12] sm:$0xff]  ;;  %v74_v42 = vld [vmem:[#allocation2 + $0x3a] sm:$0xff]  ;;  %v78_v44 = vadd.f32 %v70_v36, %v62_v27  ;;  %v79_v45 = vadd.f32 %v71_v37, %v63_v29 }
  0x15   :  { %v76_v39 = vadd.f32 %v68_v33, %v60_v25  ;;  %v72_v40 = vld [vmem:[#allocation2 + $0x2a] sm:$0xff]  ;;  %v73_v41 = vld [vmem:[#allocation2 + $0x32] sm:$0xff]  ;;  %v77_v43 = vadd.f32 %v69_v35, %v61_v26  ;;  %v82_v48 = vadd.f32 %v74_v42, %v66_v34  ;;  %v86_v52 = vld [vmem:[#allocation2 + $0x1b] sm:$0xff] }
  0x16   :  { %v80_v46 = vadd.f32 %v72_v40, %v64_v30  ;;  %v81_v47 = vadd.f32 %v73_v41, %v65_v31  ;;  %v83_v49 = vld [vmem:[#allocation2 + $0x3] sm:$0xff]  ;;  %v84_v50 = vld [vmem:[#allocation2 + $0xb] sm:$0xff]  ;;  %v85_v51 = vld [vmem:[#allocation2 + $0x13] sm:$0xff]  ;;  %v94_v60 = vadd.f32 %v86_v52, %v78_v44 }
  0x17   :  { %v87_v53 = vld [vmem:[#allocation2 + $0x23] sm:$0xff]  ;;  %v88_v54 = vld [vmem:[#allocation2 + $0x2b] sm:$0xff]  ;;  %v91_v55 = vadd.f32 %v83_v49, %v75_v38  ;;  %v92_v56 = vadd.f32 %v84_v50, %v76_v39  ;;  %v93_v57 = vadd.f32 %v85_v51, %v77_v43  ;;  %v89_v58 = vld [vmem:[#allocation2 + $0x33] sm:$0xff] }
  0x18   :  { %v90_v59 = vld [vmem:[#allocation2 + $0x3b] sm:$0xff]  ;;  %v95_v61 = vadd.f32 %v87_v53, %v79_v45  ;;  %v96_v62 = vadd.f32 %v88_v54, %v80_v46  ;;  %v99_v63 = vld [vmem:[#allocation2 + $0x4] sm:$0xff]  ;;  %v97_v9 = vadd.f32 %v89_v58, %v81_v47  ;;  %v100_v11 = vld [vmem:[#allocation2 + $0xc] sm:$0xff] }
  0x19   :  { %v98_v10 = vadd.f32 %v90_v59, %v82_v48  ;;  %v101_v12 = vld [vmem:[#allocation2 + $0x14] sm:$0xff]  ;;  %v102_v13 = vld [vmem:[#allocation2 + $0x1c] sm:$0xff]  ;;  %v107_v14 = vadd.f32 %v99_v63, %v91_v55  ;;  %v103_v15 = vld [vmem:[#allocation2 + $0x24] sm:$0xff]  ;;  %v108_v18 = vadd.f32 %v100_v11, %v92_v56 }
  0x1a   :  { %v104_v16 = vld [vmem:[#allocation2 + $0x2c] sm:$0xff]  ;;  %v105_v17 = vld [vmem:[#allocation2 + $0x34] sm:$0xff]  ;;  %v109_v19 = vadd.f32 %v101_v12, %v93_v57  ;;  %v110_v20 = vadd.f32 %v102_v13, %v94_v60  ;;  %v106_v21 = vld [vmem:[#allocation2 + $0x3c] sm:$0xff]  ;;  %v111_v22 = vadd.f32 %v103_v15, %v95_v61 }
  0x1b   :  { %v112_v23 = vadd.f32 %v104_v16, %v96_v62  ;;  %v113_v24 = vadd.f32 %v105_v17, %v97_v9  ;;  %v115_v25 = vmul.f32 0.2, %v107_v14  ;;  %v114_v26 = vadd.f32 %v106_v21, %v98_v10  ;;  %132 = vst.msk [vmem:[#allocation2 + $0x40] sm:$0x1] %vm131_vm2, %v260_v3 }
  0x1c   :  { %v116_v27 = vmul.f32 0.2, %v108_v18  ;;  %v117_v28 = vmul.f32 0.2, %v109_v19  ;;  %v118_v29 = vmul.f32 0.2, %v110_v20 }
  0x1d   :  { %v119_v30 = vmul.f32 0.2, %v111_v22  ;;  %v120_v31 = vmul.f32 0.2, %v112_v23  ;;  %v121_v32 = vmul.f32 0.2, %v113_v24 }
  0x1e   :  { %123 = vst.msk [vmem:[#allocation2] sm:$0xff] %vm16_vm0, %v115_v25  ;;  %v122_v33 = vmul.f32 0.2, %v114_v26  ;;  %124 = vst.msk [vmem:[#allocation2 + $0x8] sm:$0xff] %vm16_vm0, %v116_v27 }
  0x1f   :  { %125 = vst.msk [vmem:[#allocation2 + $0x10] sm:$0xff] %vm16_vm0, %v117_v28  ;;  %126 = vst.msk [vmem:[#allocation2 + $0x18] sm:$0xff] %vm16_vm0, %v118_v29 }
  0x20   :  { %127 = vst.msk [vmem:[#allocation2 + $0x20] sm:$0xff] %vm16_vm0, %v119_v30  ;;  %128 = vst.msk [vmem:[#allocation2 + $0x28] sm:$0xff] %vm16_vm0, %v120_v31 }
  0x21   :  { %129 = vst.msk [vmem:[#allocation2 + $0x30] sm:$0xff] %vm16_vm0, %v121_v32  ;;  %130 = vst.msk [vmem:[#allocation2 + $0x38] sm:$0xff] %vm16_vm0, %v122_v33 }
  0x25   :  { %v133_v3 = vld [vmem:[#allocation2] sm:$0xff]  ;;  %v134_v34 = vld [vmem:[#allocation2 + $0x8] sm:$0xff] }
  0x26   :  { %v135_v35 = vld [vmem:[#allocation2 + $0x10] sm:$0xff]  ;;  %v136_v36 = vld [vmem:[#allocation2 + $0x18] sm:$0xff]  ;;  %v141_v39 = vld [vmem:[#allocation2 + $0x1] sm:$0xff] }
  0x27   :  { %v137_v37 = vld [vmem:[#allocation2 + $0x20] sm:$0xff]  ;;  %v138_v38 = vld [vmem:[#allocation2 + $0x28] sm:$0xff]  ;;  %v143_v41 = vld [vmem:[#allocation2 + $0x11] sm:$0xff]  ;;  %v149_v44 = vsub.f32 %v133_v3, %v141_v39 }
  0x28   :  { %v142_v40 = vld [vmem:[#allocation2 + $0x9] sm:$0xff]  ;;  %v144_v42 = vld [vmem:[#allocation2 + $0x19] sm:$0xff]  ;;  %v145_v43 = vld [vmem:[#allocation2 + $0x21] sm:$0xff]  ;;  %v151_v47 = vsub.f32 %v135_v35, %v143_v41 }
  0x29   :  { %v150_v45 = vsub.f32 %v134_v34, %v142_v40  ;;  %v146_v46 = vld [vmem:[#allocation2 + $0x29] sm:$0xff]  ;;  %v152_v48 = vsub.f32 %v136_v36, %v144_v42  ;;  %v153_v49 = vsub.f32 %v137_v37, %v145_v43  ;;  %v147_v51 = vld [vmem:[#allocation2 + $0x31] sm:$0xff]  ;;  %v157_v52 = vmul.f32 %v149_v44, %v149_v44  ;;  %v148_v58 = vld [vmem:[#allocation2 + $0x39] sm:$0xff] }
  0x2a   :  { %v139_v50 = vld [vmem:[#allocation2 + $0x30] sm:$0xff]  ;;  %v154_v53 = vsub.f32 %v138_v38, %v146_v46  ;;  %v159_v55 = vmul.f32 %v151_v47, %v151_v47  ;;  %v140_v57 = vld [vmem:[#allocation2 + $0x38] sm:$0xff] }
  0x2b   :  { %v158_v54 = vmul.f32 %v150_v45, %v150_v45  ;;  %v160_v56 = vmul.f32 %v152_v48, %v152_v48  ;;  %v165_v59 = vsel %vm16_vm0, %v157_v52, 0.0  ;;  %v155_v60 = vsub.f32 %v139_v50, %v147_v51 }
  0x2c   :  { %v161_v61 = vmul.f32 %v153_v49, %v153_v49  ;;  %v168_v63 = vsel %vm16_vm0, %v159_v55, 0.0  ;;  %v156_v10 = vsub.f32 %v140_v57, %v148_v58  ;;  %v162_v11 = vmul.f32 %v154_v53, %v154_v53 }
  0x2d   :  { %v166_v62 = vsel %vm16_vm0, %v158_v54, 0.0  ;;  %v170_v12 = vsel %vm16_vm0, %v160_v56, 0.0  ;;  %v163_v14 = vmul.f32 %v155_v60, %v155_v60 }
  0x2e   :  { %v167_v9 = vadd.f32 %v166_v62, %v165_v59  ;;  %v172_v15 = vsel %vm16_vm0, %v161_v61, 0.0  ;;  %v164_v17 = vmul.f32 %v156_v10, %v156_v10  ;;  %v174_v18 = vsel %vm16_vm0, %v162_v11, 0.0 }
  0x2f   :  { %v176_v20 = vsel %vm16_vm0, %v163_v14, 0.0 }
  0x30   :  { %v169_v13 = vadd.f32 %v168_v63, %v167_v9  ;;  %v178_v22 = vsel %vm16_vm0, %v164_v17, 0.0 }
  0x32   :  { %v171_v16 = vadd.f32 %v170_v12, %v169_v13 }
  0x34   :  { %v173_v19 = vadd.f32 %v172_v15, %v171_v16 }
  0x36   :  { %v175_v21 = vadd.f32 %v174_v18, %v173_v19 }
  0x38   :  { %v177_v23 = vadd.f32 %v176_v20, %v175_v21 }
  0x3a   :  { %v179_v24 = vadd.f32 %v178_v22, %v177_v23 }
  0x3c   :  { %180 = vadd.xlane.f32.xlu0 %v179_v24 }
  0xc9   :  { %v181_v25 = vpop.xlane.xlu0 %180 }
  0xca   :  { %v182_v26 = vrot.slane %v181_v25, 4 }
  0xcc   :  { %v183_v27 = vadd.f32 %v182_v26, %v181_v25 }
  0xce   :  { %v184_v28 = vrot.slane %v183_v27, 2 }
  0xd0   :  { %v185_v29 = vadd.f32 %v184_v28, %v183_v27 }
  0xd2   :  { %v186_v30 = vrot.slane %v185_v29, 1 }
  0xd4   :  { %v187_v31 = vadd.f32 %v186_v30, %v185_v29 }
  0xd6   :  { %253 = vpush %v187_v31 }
 0x107   :  { %s254_s0 = spop %253 }
 0x108   :  { %v189_v32 = vstv %s254_s0 }
 0x109   :  { %258 = vrcp.f32 %v189_v32 }
 0x113   :  { %v259_v33 = vpop.eup %258 }
 0x114   :  { %255 = vpush %v259_v33 }
 0x145   :  { %s256_s22 = spop %255 }
 0x146   :  { %v192_v3 = vstv %s256_s22 }
 0x147   :  { %v193_v34 = vmul.f32 %v192_v3, %v157_v52  ;;  %v194_v35 = vmul.f32 %v192_v3, %v158_v54  ;;  %v195_v36 = vmul.f32 %v192_v3, %v159_v55  ;;  %v196_v37 = vmul.f32 %v192_v3, %v160_v56 }
 0x148   :  { %v197_v38 = vmul.f32 %v192_v3, %v161_v61  ;;  %v198_v39 = vmul.f32 %v192_v3, %v162_v11  ;;  %v199_v40 = vmul.f32 %v192_v3, %v163_v14  ;;  %v200_v41 = vmul.f32 %v192_v3, %v164_v17 }
 0x149   :  { %v201_v42 = vsub.f32 1.0, %v193_v34  ;;  %v202_v43 = vsub.f32 1.0, %v194_v35  ;;  %v203_v44 = vsub.f32 1.0, %v195_v36  ;;  %v204_v45 = vsub.f32 1.0, %v196_v37 }
 0x14a   :  { %v205_v46 = vsub.f32 1.0, %v197_v38  ;;  %v206_v47 = vsub.f32 1.0, %v198_v39  ;;  %v207_v48 = vsub.f32 1.0, %v199_v40  ;;  %v208_v49 = vsub.f32 1.0, %v200_v41 }
 0x14b   :  { %v209_v50 = vmul.f32 %v201_v42, %v201_v42  ;;  %v210_v51 = vmul.f32 %v202_v43, %v202_v43  ;;  %v211_v53 = vmul.f32 %v203_v44, %v203_v44  ;;  %v212_v57 = vmul.f32 %v204_v45, %v204_v45 }
 0x14c   :  { %v213_v52 = vmul.f32 %v205_v46, %v205_v46  ;;  %v214_v54 = vmul.f32 %v206_v47, %v206_v47  ;;  %v215_v55 = vmul.f32 %v207_v48, %v207_v48  ;;  %v216_v56 = vmul.f32 %v208_v49, %v208_v49 }
 0x14d   :  { %v217_v58 = vmul.f32 %v209_v50, %v209_v50  ;;  %v218_v59 = vmul.f32 %v210_v51, %v210_v51  ;;  %v219_v60 = vmul.f32 %v211_v53, %v211_v53  ;;  %v220_v61 = vmul.f32 %v212_v57, %v212_v57 }
 0x14e   :  { %v221_v62 = vmul.f32 %v213_v52, %v213_v52  ;;  %v222_v63 = vmul.f32 %v214_v54, %v214_v54  ;;  %v223_v9 = vmul.f32 %v215_v55, %v215_v55  ;;  %v224_v10 = vmul.f32 %v216_v56, %v216_v56 }
 0x14f   :  { %v225_v11 = vmul.f32 %v217_v58, %v201_v42  ;;  %v226_v12 = vmul.f32 %v218_v59, %v202_v43  ;;  %v227_v13 = vmul.f32 %v219_v60, %v203_v44  ;;  %v228_v14 = vmul.f32 %v220_v61, %v204_v45 }
 0x150   :  { %v229_v15 = vmul.f32 %v221_v62, %v205_v46  ;;  %v230_v16 = vmul.f32 %v222_v63, %v206_v47  ;;  %v231_v17 = vmul.f32 %v223_v9, %v207_v48  ;;  %v232_v18 = vmul.f32 %v224_v10, %v208_v49 }
 0x151   :  { %v233_v19 = vmul.f32 %v225_v11, %v274_v0  ;;  %v234_v20 = vmul.f32 %v226_v12, %v279_v1  ;;  %v235_v21 = vmul.f32 %v227_v13, %v284_v2  ;;  %v236_v22 = vmul.f32 %v228_v14, %v306_v4 }
 0x152   :  { %v237_v23 = vmul.f32 %v229_v15, %v311_v5  ;;  %v238_v24 = vmul.f32 %v230_v16, %v316_v6  ;;  %v239_v25 = vmul.f32 %v231_v17, %v327_v7  ;;  %v240_v26 = vmul.f32 %v232_v18, %v332_v8 }
 0x153   :  { %241 = vst.msk [vmem:[%s403_s1] sm:$0xff] %vm16_vm0, %v233_v19  ;;  %242 = vst.msk [vmem:[%s403_s1 + $0x8] sm:$0xff] %vm16_vm0, %v234_v20 }
 0x154   :  { %243 = vst.msk [vmem:[%s403_s1 + $0x10] sm:$0xff] %vm16_vm0, %v235_v21  ;;  %244 = vst.msk [vmem:[%s403_s1 + $0x18] sm:$0xff] %vm16_vm0, %v236_v22 }
 0x155   :  { %245 = vst.msk [vmem:[%s403_s1 + $0x20] sm:$0xff] %vm16_vm0, %v237_v23  ;;  %246 = vst.msk [vmem:[%s403_s1 + $0x28] sm:$0xff] %vm16_vm0, %v238_v24 }
 0x156   :  { %247 = vst.msk [vmem:[%s403_s1 + $0x30] sm:$0xff] %vm16_vm0, %v239_v25  ;;  %248 = vst.msk [vmem:[%s403_s1 + $0x38] sm:$0xff] %vm16_vm0, %v240_v26 }

</bundles_post_ra>
